<compile_context>
chip_gen: v7x
topology: tpu7x:2x2x1
jax: 0.10.0
libtpu: 0.0.40
codegen_flags: <defaults>
</compile_context>

<pallas_src>
import functools
import math

import numpy as np
import jax
import jax.numpy as jnp
from jax import lax
from jax.experimental import pallas as pl
from jax.experimental.pallas import tpu as pltpu

LN_EPS = 1e-5


def _row_tile(n_rows: int, cap: int = 512) -> int:
    """Largest row tile <= cap that divides n_rows (multiple of 8 when possible).

    Note: when n_rows <= cap the full extent is returned (always legal since the
    block then equals the array dim).  For very large, awkward N lower `cap`
    (e.g. 256 on v7x) so the resident weights + double-buffered row tiles stay
    inside the scoped VMEM budget.
    """
    if n_rows <= cap:
        return n_rows
    t = cap - (cap % 8)
    while t >= 8:
        if n_rows % t == 0:
            return t
        t -= 8
    return n_rows


# ---------------------------------------------------------------------------
# Kernel 1: fused Q/K/V projection     qkv = x @ W_qkv + b_qkv
# ---------------------------------------------------------------------------
def _qkv_proj_kernel(x_ref, w_ref, b_ref, o_ref):
    acc = jnp.dot(x_ref[...], w_ref[...], preferred_element_type=jnp.float32)
    o_ref[...] = (acc + b_ref[...]).astype(o_ref.dtype)


def _qkv_projection(x2d, w_qkv, b_qkv):
    n, d = x2d.shape
    d3 = w_qkv.shape[1]
    tm = _row_tile(n)
    return pl.pallas_call(
        _qkv_proj_kernel,
        out_shape=jax.ShapeDtypeStruct((n, d3), x2d.dtype),
        grid=(n // tm,),
        in_specs=[
            pl.BlockSpec((tm, d), lambda i: (i, 0)),
            pl.BlockSpec((d, d3), lambda i: (0, 0)),   # weights resident across grid
            pl.BlockSpec((1, d3), lambda i: (0, 0)),
        ],
        out_specs=pl.BlockSpec((tm, d3), lambda i: (i, 0)),
        compiler_params=pltpu.CompilerParams(dimension_semantics=("parallel",)),
    )(x2d, w_qkv, b_qkv)


# ---------------------------------------------------------------------------
# Kernel 2: multi-head scaled dot-product attention, one batch per grid step.
# All heads are processed in-kernel from one lane-dense (S, 3D) qkv block; the
# per-head slice is a static column window of the VMEM tile (no transposes).
# ---------------------------------------------------------------------------
def _attention_kernel(qkv_ref, bias_ref, o_ref, *, num_heads, d_k, scale):
    d = num_heads * d_k
    bias = bias_ref[...]                               # (S, S) additive mask, f32
    heads = []
    for h in range(num_heads):                         # static loop over heads
        q = qkv_ref[:, h * d_k:(h + 1) * d_k]
        k = qkv_ref[:, d + h * d_k:d + (h + 1) * d_k]
        v = qkv_ref[:, 2 * d + h * d_k:2 * d + (h + 1) * d_k]
        # scores = q @ k^T * scale + bias   (contract on d_k, no transpose)
        scores = lax.dot_general(q, k, (((1,), (1,)), ((), ())),
                                 preferred_element_type=jnp.float32) * scale + bias
        m = jnp.max(scores, axis=-1, keepdims=True)
        p = jnp.exp(scores - m)
        attn = p / jnp.sum(p, axis=-1, keepdims=True)
        # TODO(synk): nn.Dropout on attention probs omitted — inference-mode identity.
        heads.append(jnp.dot(attn.astype(v.dtype), v,
                             preferred_element_type=jnp.float32))
    # Concatenating per-head contexts along lanes reproduces the PyTorch
    # transpose(1,2).contiguous().view(B, S, D) layout directly.
    o_ref[...] = jnp.concatenate(heads, axis=-1).astype(o_ref.dtype)


def _multi_head_attention(qkv_b, bias, num_heads, d_k):
    """qkv_b: (B, S, 3D); bias: (B, S, S) additive mask (0 / -1e9)."""
    b, s, d3 = qkv_b.shape
    d = d3 // 3
    kernel = functools.partial(_attention_kernel, num_heads=num_heads, d_k=d_k,
                               scale=1.0 / math.sqrt(d_k))
    return pl.pallas_call(
        kernel,
        out_shape=jax.ShapeDtypeStruct((b, s, d), qkv_b.dtype),
        grid=(b,),
        in_specs=[
            pl.BlockSpec((None, s, d3), lambda i: (i, 0, 0)),
            pl.BlockSpec((None, s, s), lambda i: (i, 0, 0)),
        ],
        out_specs=pl.BlockSpec((None, s, d), lambda i: (i, 0, 0)),
        compiler_params=pltpu.CompilerParams(dimension_semantics=("parallel",)),
    )(qkv_b, bias)


# ---------------------------------------------------------------------------
# Shared in-kernel LayerNorm (biased variance, eps=1e-5, PyTorch semantics)
# ---------------------------------------------------------------------------
def _layer_norm(y, gamma, beta):
    mean = jnp.mean(y, axis=-1, keepdims=True)
    var = jnp.mean(jnp.square(y - mean), axis=-1, keepdims=True)
    return (y - mean) * lax.rsqrt(var + LN_EPS) * gamma + beta


# ---------------------------------------------------------------------------
# Kernel 3: output projection + residual + LN1 + FFN + residual + LN2 (fused)
# ---------------------------------------------------------------------------
def _post_attn_kernel(ctx_ref, x_ref, wo_ref, bo_ref, g1_ref, bln1_ref,
                      w1_ref, b1_ref, w2_ref, b2_ref, g2_ref, bln2_ref, o_ref):
    x = x_ref[...].astype(jnp.float32)
    proj = jnp.dot(ctx_ref[...], wo_ref[...],
                   preferred_element_type=jnp.float32) + bo_ref[...]
    # TODO(synk): nn.Dropout on the residual paths omitted — inference-mode identity.
    y = _layer_norm(x + proj, g1_ref[...], bln1_ref[...])
    h = jnp.maximum(
        jnp.dot(y, w1_ref[...], preferred_element_type=jnp.float32) + b1_ref[...],
        0.0)                                   # ReLU, kept as a value (no scratch store)
    ff = jnp.dot(h, w2_ref[...], preferred_element_type=jnp.float32) + b2_ref[...]
    o_ref[...] = _layer_norm(y + ff, g2_ref[...], bln2_ref[...]).astype(o_ref.dtype)


def _post_attention(ctx2d, x2d, w_o, b_o, g1, bln1, w1, b1, w2, b2, g2, bln2):
    n, d = x2d.shape
    dff = w1.shape[1]
    tm = _row_tile(n)
    row_spec = pl.BlockSpec((tm, d), lambda i: (i, 0))
    const_d = pl.BlockSpec((1, d), lambda i: (0, 0))
    return pl.pallas_call(
        _post_attn_kernel,
        out_shape=jax.ShapeDtypeStruct((n, d), x2d.dtype),
        grid=(n // tm,),
        in_specs=[row_spec, row_spec,
                  pl.BlockSpec((d, d), lambda i: (0, 0)), const_d,      # w_o, b_o
                  const_d, const_d,                                     # ln1 gamma/beta
                  pl.BlockSpec((d, dff), lambda i: (0, 0)),
                  pl.BlockSpec((1, dff), lambda i: (0, 0)),             # w_1, b_1
                  pl.BlockSpec((dff, d), lambda i: (0, 0)), const_d,    # w_2, b_2
                  const_d, const_d],                                    # ln2 gamma/beta
        out_specs=row_spec,
        compiler_params=pltpu.CompilerParams(dimension_semantics=("parallel",)),
    )(ctx2d, x2d, w_o, b_o, g1, bln1, w1, b1, w2, b2, g2, bln2)


# ---------------------------------------------------------------------------
# Full EncoderLayer forward
# ---------------------------------------------------------------------------
def encoder_layer_forward(x, params, mask=None):
    """x: (B, S, D) float32; mask: optional (B, S, S), 0 == masked-out key."""
    b, s, d = x.shape
    h = params["num_heads"]
    dk = d // h
    n = b * s
    x2d = x.reshape(n, d)

    # --- masked multi-head self-attention ---------------------------------
    w_qkv = jnp.concatenate([params["w_q"], params["w_k"], params["w_v"]], axis=1)
    b_qkv = jnp.concatenate([params["b_q"], params["b_k"], params["b_v"]])[None, :]
    qkv = _qkv_projection(x2d, w_qkv, b_qkv)            # (N, 3D)
    qkv_b = qkv.reshape(b, s, 3 * d)                    # free reshape (row-major)

    if mask is None:
        bias = jnp.zeros((b, s, s), jnp.float32)
    else:
        # additive mask bias: 0 where attended, -1e9 where masked out
        bias = jnp.where(mask == 0, jnp.float32(-1e9), jnp.float32(0.0))

    ctx = _multi_head_attention(qkv_b, bias, h, dk)     # (B, S, D), merged-head layout
    ctx2d = ctx.reshape(n, d)                           # free reshape

    # --- proj + residual + LN1 + FFN + residual + LN2 (single fused kernel) -
    out2d = _post_attention(
        ctx2d, x2d,
        params["w_o"], params["b_o"][None, :],
        params["ln1_g"][None, :], params["ln1_b"][None, :],
        params["w_1"], params["b_1"][None, :],
        params["w_2"], params["b_2"][None, :],
        params["ln2_g"][None, :], params["ln2_b"][None, :])
    return out2d.reshape(b, s, d)


# ---------------------------------------------------------------------------
# Pure-JAX reference (high-precision dots) for correctness checking
# ---------------------------------------------------------------------------
def _layer_norm_ref(y, g, b):
    m = jnp.mean(y, axis=-1, keepdims=True)
    v = jnp.mean(jnp.square(y - m), axis=-1, keepdims=True)
    return (y - m) * lax.rsqrt(v + LN_EPS) * g + b


def encoder_layer_reference(x, params, mask=None):
    hp = lax.Precision.HIGHEST
    b, s, d = x.shape
    h = params["num_heads"]
    dk = d // h

    def linear(t, w, bias):
        return jnp.dot(t, w, precision=hp) + bias

    q = linear(x, params["w_q"], params["b_q"]).reshape(b, s, h, dk).transpose(0, 2, 1, 3)
    k = linear(x, params["w_k"], params["b_k"]).reshape(b, s, h, dk).transpose(0, 2, 1, 3)
    v = linear(x, params["w_v"], params["b_v"]).reshape(b, s, h, dk).transpose(0, 2, 1, 3)
    scores = jnp.einsum("bhqe,bhke->bhqk", q, k, precision=hp) / np.sqrt(dk)
    if mask is not None:
        scores = jnp.where(mask[:, None, :, :] == 0, -jnp.inf, scores)
    attn = jax.nn.softmax(scores, axis=-1)
    ctx = jnp.einsum("bhqk,bhke->bhqe", attn, v, precision=hp)
    ctx = ctx.transpose(0, 2, 1, 3).reshape(b, s, d)
    y = _layer_norm_ref(x + linear(ctx, params["w_o"], params["b_o"]),
                        params["ln1_g"], params["ln1_b"])
    ff = linear(jax.nn.relu(linear(y, params["w_1"], params["b_1"])),
                params["w_2"], params["b_2"])
    return _layer_norm_ref(y + ff, params["ln2_g"], params["ln2_b"])


def init_params(key, d_model, num_heads, d_ff):
    """Mimics PyTorch nn.Linear default init (uniform +-1/sqrt(fan_in))."""
    def linear_init(k, fan_in, fan_out):
        kw, kb = jax.random.split(k)
        bound = 1.0 / np.sqrt(fan_in)
        w = jax.random.uniform(kw, (fan_in, fan_out), jnp.float32, -bound, bound)
        bias = jax.random.uniform(kb, (fan_out,), jnp.float32, -bound, bound)
        return w, bias

    ks = jax.random.split(key, 6)
    w_q, b_q = linear_init(ks[0], d_model, d_model)
    w_k, b_k = linear_init(ks[1], d_model, d_model)
    w_v, b_v = linear_init(ks[2], d_model, d_model)
    w_o, b_o = linear_init(ks[3], d_model, d_model)
    w_1, b_1 = linear_init(ks[4], d_model, d_ff)
    w_2, b_2 = linear_init(ks[5], d_ff, d_model)
    return dict(
        num_heads=num_heads,
        w_q=w_q, b_q=b_q, w_k=w_k, b_k=b_k, w_v=w_v, b_v=b_v, w_o=w_o, b_o=b_o,
        w_1=w_1, b_1=b_1, w_2=w_2, b_2=b_2,
        ln1_g=jnp.ones((d_model,), jnp.float32), ln1_b=jnp.zeros((d_model,), jnp.float32),
        ln2_g=jnp.ones((d_model,), jnp.float32), ln2_b=jnp.zeros((d_model,), jnp.float32),
    )


if __name__ == "__main__":
    # Small but TPU-friendly shapes: d_model is a multiple of 128 (lane-dense).
    B, S, D, H, D_FF = 2, 16, 128, 4, 256

    key = jax.random.PRNGKey(0)
    k_x, k_p = jax.random.split(key)
    x = jax.random.normal(k_x, (B, S, D), dtype=jnp.float32)
    params = init_params(k_p, D, H, D_FF)

    # Padding-style attention mask: batch element 1 cannot attend to the last 3 keys.
    mask_np = np.ones((B, S, S), dtype=np.float32)
    mask_np[1, :, S - 3:] = 0.0
    mask = jnp.asarray(mask_np)

    out = encoder_layer_forward(x, params, mask)
    out = jax.block_until_ready(out)

    ref = encoder_layer_reference(x, params, mask)
    np.testing.assert_allclose(np.asarray(out), np.asarray(ref), rtol=5e-3, atol=5e-3)

    # Also exercise the unmasked path once.
    out_nm = jax.block_until_ready(encoder_layer_forward(x, params, None))
    ref_nm = encoder_layer_reference(x, params, None)
    np.testing.assert_allclose(np.asarray(out_nm), np.asarray(ref_nm), rtol=5e-3, atol=5e-3)

    print("KERNEL_OK")
</pallas_src>

<mosaic_0001>
module attributes {stable_mosaic.version = 11 : i64} {
  func.func @_qkv_proj_kernel(%arg0: i32, %arg1: memref<32x128xf32, #tpu.memory_space<vmem>>, %arg2: memref<128x384xf32, #tpu.memory_space<vmem>>, %arg3: memref<1x384xf32, #tpu.memory_space<vmem>>, %arg4: memref<32x384xf32, #tpu.memory_space<vmem>>) attributes {dimension_semantics = [#tpu.dimension_semantics<parallel>], iteration_bounds = array<i64: 1>, scalar_prefetch = 0 : i64, scratch_operands = 0 : i64, tpu.core_type = #tpu.core_type<tc>, window_params = [{transform_indices = @transform_0, window_bounds = array<i64: 32, 128>}, {pipeline_mode = #tpu.pipeline_mode<synchronous>, transform_indices = @transform_1, window_bounds = array<i64: 128, 384>}, {pipeline_mode = #tpu.pipeline_mode<synchronous>, transform_indices = @transform_2, window_bounds = array<i64: 1, 384>}, {transform_indices = @transform_3, window_bounds = array<i64: 32, 384>}]} {
    %c0 = arith.constant 0 : index
    %c0_0 = arith.constant 0 : index
    %0 = vector.load %arg1[%c0, %c0_0] : memref<32x128xf32, #tpu.memory_space<vmem>>, vector<32x128xf32>
    %c0_1 = arith.constant 0 : index
    %c0_2 = arith.constant 0 : index
    %1 = vector.load %arg2[%c0_1, %c0_2] : memref<128x384xf32, #tpu.memory_space<vmem>>, vector<128x384xf32>
    %cst = arith.constant dense<0.000000e+00> : vector<32x384xf32>
    %2 = tpu.matmul %0, %1, %cst {dimension_numbers = #tpu.dot_dimension_numbers<[1], [0], [0], [1], [0, 0, 1, 1], [], []>} : vector<32x128xf32>, vector<128x384xf32>, vector<32x384xf32> -> vector<32x384xf32>
    %c0_3 = arith.constant 0 : index
    %c0_4 = arith.constant 0 : index
    %3 = vector.load %arg3[%c0_3, %c0_4] : memref<1x384xf32, #tpu.memory_space<vmem>>, vector<1x384xf32>
    %4 = vector.broadcast %3 : vector<1x384xf32> to vector<32x384xf32>
    %5 = arith.addf %2, %4 : vector<32x384xf32>
    %c0_5 = arith.constant 0 : index
    %c0_6 = arith.constant 0 : index
    %6 = vector.load %arg4[%c0_5, %c0_6] : memref<32x384xf32, #tpu.memory_space<vmem>>, vector<32x384xf32>
    tpu.vector_store %arg4[%c0_5, %c0_6], %5 {strides = array<i32>} : memref<32x384xf32, #tpu.memory_space<vmem>>, vector<32x384xf32>,
    return
  }
  func.func @transform_0(%arg0: i32) -> (i32, i32) {
    %c0_i32 = arith.constant 0 : i32
    %c0_i32_0 = arith.constant 0 : i32
    return %arg0, %c0_i32 : i32, i32
  }
  func.func @transform_1(%arg0: i32) -> (i32, i32) {
    %c0_i32 = arith.constant 0 : i32
    %c0_i32_0 = arith.constant 0 : i32
    %c0_i32_1 = arith.constant 0 : i32
    return %c0_i32, %c0_i32_0 : i32, i32
  }
  func.func @transform_2(%arg0: i32) -> (i32, i32) {
    %c0_i32 = arith.constant 0 : i32
    %c0_i32_0 = arith.constant 0 : i32
    %c0_i32_1 = arith.constant 0 : i32
    return %c0_i32, %c0_i32_0 : i32, i32
  }
  func.func @transform_3(%arg0: i32) -> (i32, i32) {
    %c0_i32 = arith.constant 0 : i32
    %c0_i32_0 = arith.constant 0 : i32
    return %arg0, %c0_i32 : i32, i32
  }
}

</mosaic_0001>

<bundles_post_ra>
// kernel: tpu_custom_call.1
= control target key start
LH: loop header
LB: loop body
LE: loop exit
PB: predicated region body
PF: predicated region fallthrough
CT: control target
= control target key end

     0   :  { %8 = vsyncpa [#allocation3], 0  ;;  %s595_s0 = inlined_call_operand.hbm [shape: f32[32,128], index: 0, kind: input, shape index: {}]   ;;  %s596_s1 = inlined_call_operand.hbm [shape: f32[128,384], index: 1, kind: input, shape index: {}]   ;;  %s597_s2 = inlined_call_operand.vmem [shape: f32[1,384], index: 2, kind: input, shape index: {}]   ;;  %s598_s3 = inlined_call_operand.hbm [shape: f32[32,384], index: 3, kind: output, shape index: {}]  }
   0x1   :  { %9 = vsyncpa [#allocation6], 0 }
   0x2   :  { %10 = vsyncpa [#allocation4], 0  ;;  %s518_s12 = smov [#allocation2]   ;;  %s446_s16 = scalar_lea.hbm %s595_s0, 512 }
   0x3   :  { %s16_s13 = sshll.u32 %s518_s12, 4  ;;  %p447_p0 = scmp.ne.s32.totalorder %s595_s0, %s446_s16  ;;  %s17_s13 = int_to_ptr.vmem [resolvable:$true] %s16_s13 }
   0x4   :  { %p450_p1 = scmp.lt.u32.totalorder %s446_s16, %s595_s0 }
   0x6   :  { %p452_p2 = pnand %p450_p1, %p447_p0 }
   0x8   :  { %455 = shalt.err (!%p452_p2)
}
   0x9   :  { %s456_s21 = scalar_lea.vmem %s17_s13, 512  ;;  %p461_p4 = scmp.lt.s32.totalorder %s17_s13, %s17_s13 }
   0xa   :  { %p457_p3 = scmp.ne.s32.totalorder %s17_s13, %s456_s21  ;;  %p462_p5 = scmp.lt.s32.totalorder %s456_s21, %s456_s21 }
   0xc   :  { %p463_p6 = por %p462_p5, %p461_p4 }
   0xe   :  { %p464_p7 = pnand %p463_p6, %p457_p3 }
  0x10   :  { %467 = shalt.err (!%p464_p7)
}
  0x11   :  { %s519_s22 = smov 128   ;;  %s520_s23 = smov 8  }
  0x12   :  { %22 = dma.hbm_to_vmem [thread:$0]  %s595_s0, 512, %s17_s13, [#allocation3], %s519_s22, %s519_s22, %s520_s23  }
  0x13   :  { %s521_s26 = smov [#allocation5]   ;;  %s468_s30 = scalar_lea.hbm %s596_s1, 6144 }
  0x14   :  { %s28_s27 = sshll.u32 %s521_s26, 4  ;;  %p469_p8 = scmp.ne.s32.totalorder %s596_s1, %s468_s30  ;;  %s29_s27 = int_to_ptr.vmem [resolvable:$true] %s28_s27 }
  0x15   :  { %p472_p9 = scmp.lt.u32.totalorder %s468_s30, %s596_s1 }
  0x17   :  { %p474_p10 = pnand %p472_p9, %p469_p8 }
  0x19   :  { %477 = shalt.err (!%p474_p10)
}
  0x1a   :  { %s478_s8 = scalar_lea.vmem %s29_s27, 6144  ;;  %p483_p12 = scmp.lt.s32.totalorder %s29_s27, %s29_s27 }
  0x1b   :  { %p479_p11 = scmp.ne.s32.totalorder %s29_s27, %s478_s8  ;;  %p484_p13 = scmp.lt.s32.totalorder %s478_s8, %s478_s8 }
  0x1d   :  { %p485_p0 = por %p484_p13, %p483_p12 }
  0x1f   :  { %p486_p1 = pnand %p485_p0, %p479_p11 }
  0x21   :  { %489 = shalt.err (!%p486_p1)
}
  0x22   :  { %s522_s0 = smov 384   ;;  %s523_s9 = smov 24  }
  0x23   :  { %34 = dma.hbm_to_vmem [thread:$0]  %s596_s1, 6144, %s29_s27, [#allocation6], %s522_s0, %s522_s0, %s523_s9  }
  0x24   :  { %512 = dma.done.wait [#allocation3], 512  }
  0x25   :  { %513 = vsyncadd [#allocation3], 4294966784 }
  0x26   :  { %514 = dma.done.wait [#allocation6], 6144  }
  0x27   :  { %515 = vsyncadd [#allocation6], 4294961152  ;;  %v524_v0 = vmov 0.0   ;;  %v48_v1 = vld [vmem:[#allocation5 + $0x8] sm:$0xff]  ;;  %v51_v2 = vld [vmem:[#allocation5 + $0x20] sm:$0xff] }
  0x28   :  { %176 = vmatprep.mubr.f32.mxu0 %v524_v0  ;;  %v47_v3 = vld [vmem:[#allocation5] sm:$0xff]  ;;  %v374_v4 = vpack.c.bf16 %v51_v2, %v48_v1  ;;  %v50_v5 = vld [vmem:[#allocation5 + $0x18] sm:$0xff]  ;;  %v57_v7 = vld [vmem:[#allocation5 + $0x50] sm:$0xff] }
  0x29   :  { %v54_v6 = vld [vmem:[#allocation5 + $0x38] sm:$0xff]  ;;  %v376_v8 = vpack.c.bf16 %v50_v5, %v47_v3  ;;  %v53_v10 = vld [vmem:[#allocation5 + $0x30] sm:$0xff]  ;;  %v56_v11 = vld [vmem:[#allocation5 + $0x48] sm:$0xff] }
  0x2a   :  { %v378_v9 = vpack.c.bf16 %v57_v7, %v54_v6  ;;  %v49_v12 = vld [vmem:[#allocation5 + $0x10] sm:$0xff]  ;;  %375 = vmatprep.subr.bf16.mxu0 %v374_v4  ;;  %v52_v13 = vld [vmem:[#allocation5 + $0x28] sm:$0xff]  ;;  %v63_v15 = vld [vmem:[#allocation5 + $0x80] sm:$0xff]  ;;  %v380_v16 = vpack.c.bf16 %v56_v11, %v53_v10 }
  0x2b   :  { %v60_v14 = vld [vmem:[#allocation5 + $0x68] sm:$0xff]  ;;  %377 = vmatpush1.bf16.msra.mxu0 %v376_v8  ;;  %v406_v17 = vpack.c.bf16 %v52_v13, %v49_v12  ;;  %v55_v18 = vld [vmem:[#allocation5 + $0x40] sm:$0xff]  ;;  %v62_v21 = vld [vmem:[#allocation5 + $0x78] sm:$0xff] }
  0x2c   :  { %379 = vmatprep.subr.bf16.mxu0 %v378_v9  ;;  %v382_v19 = vpack.c.bf16 %v63_v15, %v60_v14  ;;  %v59_v20 = vld [vmem:[#allocation5 + $0x60] sm:$0xff]  ;;  %v58_v22 = vld [vmem:[#allocation5 + $0x58] sm:$0xff]  ;;  %v69_v25 = vld [vmem:[#allocation5 + $0xb0] sm:$0xff]  ;;  %v97_v14 = vlaneseq }
  0x2d   :  { %407 = vmatprep.subr.bf16.mxu1 %v406_v17  ;;  %v410_v23 = vpack.c.bf16 %v58_v22, %v55_v18  ;;  %v66_v24 = vld [vmem:[#allocation5 + $0x98] sm:$0xff]  ;;  %v61_v26 = vld [vmem:[#allocation5 + $0x70] sm:$0xff]  ;;  %v64_v27 = vld [vmem:[#allocation5 + $0x88] sm:$0xff]  ;;  %v384_v28 = vpack.c.bf16 %v62_v21, %v59_v20 }
  0x2e   :  { %409 = vmatpush3.bf16.msra.mxu1 %v406_v17  ;;  %v65_v29 = vld [vmem:[#allocation5 + $0x90] sm:$0xff]  ;;  %v414_v30 = vpack.c.bf16 %v64_v27, %v61_v26  ;;  %v386_v31 = vpack.c.bf16 %v69_v25, %v66_v24  ;;  %v68_v32 = vld [vmem:[#allocation5 + $0xa8] sm:$0xff]  ;;  %v67_v33 = vld [vmem:[#allocation5 + $0xa0] sm:$0xff]  ;;  %v98_v15 = vshrl.u32 %v97_v14, 7 }
  0x2f   :  { %381 = vmatpush1.bf16.msra.mxu0 %v380_v16  ;;  %411 = vmatprep.subr.bf16.mxu1 %v410_v23  ;;  %v70_v34 = vld [vmem:[#allocation5 + $0xb8] sm:$0xff]  ;;  %v72_v35 = vld [vmem:[#allocation5 + $0xc8] sm:$0xff]  ;;  %v75_v36 = vld [vmem:[#allocation5 + $0xe0] sm:$0xff]  ;;  %v388_v37 = vpack.c.bf16 %v68_v32, %v65_v29 }
  0x30   :  { %383 = vmatprep.subr.bf16.mxu0 %v382_v19  ;;  %v71_v38 = vld [vmem:[#allocation5 + $0xc0] sm:$0xff]  ;;  %v418_v39 = vpack.c.bf16 %v70_v34, %v67_v33  ;;  %v390_v40 = vpack.c.bf16 %v75_v36, %v72_v35  ;;  %v74_v41 = vld [vmem:[#allocation5 + $0xd8] sm:$0xff]  ;;  %v73_v42 = vld [vmem:[#allocation5 + $0xd0] sm:$0xff]  ;;  %v99_v16 = vsub.s32 0, %v98_v15  ;;  %v103_v18 = vsub.s32 1, %v98_v15 }
  0x31   :  { %v76_v43 = vld [vmem:[#allocation5 + $0xe8] sm:$0xff]  ;;  %v78_v44 = vld [vmem:[#allocation5 + $0xf8] sm:$0xff]  ;;  %v81_v45 = vld [vmem:[#allocation5 + $0x110] sm:$0xff]  ;;  %v392_v46 = vpack.c.bf16 %v74_v41, %v71_v38  ;;  %v107_v19 = vsub.s32 2, %v98_v15 }
  0x32   :  { %413 = vmatpush3.bf16.msra.mxu1 %v410_v23  ;;  %v77_v47 = vld [vmem:[#allocation5 + $0xf0] sm:$0xff]  ;;  %v422_v48 = vpack.c.bf16 %v76_v43, %v73_v42  ;;  %v43_v49 = vld [vmem:[#allocation2] sm:$0xff]  ;;  %v394_v50 = vpack.c.bf16 %v81_v45, %v78_v44  ;;  %v80_v51 = vld [vmem:[#allocation5 + $0x108] sm:$0xff] }
  0x33   :  { %385 = vmatpush1.bf16.msra.mxu0 %v384_v28  ;;  %415 = vmatprep.subr.bf16.mxu1 %v414_v30  ;;  %v79_v52 = vld [vmem:[#allocation5 + $0x100] sm:$0xff]  ;;  %v82_v53 = vld [vmem:[#allocation5 + $0x118] sm:$0xff]  ;;  %v84_v54 = vld [vmem:[#allocation5 + $0x128] sm:$0xff]  ;;  %v396_v56 = vpack.c.bf16 %v80_v51, %v77_v47 }
  0x34   :  { %387 = vmatprep.subr.bf16.mxu0 %v386_v31  ;;  %368 = vmatprep.mubr.f32.mxu1 %v43_v49  ;;  %v87_v55 = vld [vmem:[#allocation5 + $0x140] sm:$0xff]  ;;  %v426_v58 = vpack.c.bf16 %v82_v53, %v79_v52  ;;  %v86_v60 = vld [vmem:[#allocation5 + $0x138] sm:$0xff]  ;;  %v85_v61 = vld [vmem:[#allocation5 + $0x130] sm:$0xff] }
  0x35   :  { %v83_v57 = vld [vmem:[#allocation5 + $0x120] sm:$0xff]  ;;  %v398_v59 = vpack.c.bf16 %v87_v55, %v84_v54  ;;  %v88_v62 = vld [vmem:[#allocation5 + $0x148] sm:$0xff]  ;;  %v90_v63 = vld [vmem:[#allocation5 + $0x158] sm:$0xff] }
  0x36   :  { %417 = vmatpush3.bf16.msra.mxu1 %v414_v30  ;;  %v93_v1 = vld [vmem:[#allocation5 + $0x170] sm:$0xff]  ;;  %v400_v2 = vpack.c.bf16 %v86_v60, %v83_v57  ;;  %v430_v4 = vpack.c.bf16 %v88_v62, %v85_v61  ;;  %v92_v6 = vld [vmem:[#allocation5 + $0x168] sm:$0xff]  ;;  %v91_v7 = vld [vmem:[#allocation5 + $0x160] sm:$0xff] }
  0x37   :  { %389 = vmatpush1.bf16.msra.mxu0 %v388_v37  ;;  %419 = vmatprep.subr.bf16.mxu1 %v418_v39  ;;  %v89_v3 = vld [vmem:[#allocation5 + $0x150] sm:$0xff]  ;;  %v402_v5 = vpack.c.bf16 %v93_v1, %v90_v63  ;;  %v94_v8 = vld [vmem:[#allocation5 + $0x178] sm:$0xff]  ;;  %v44_v11 = vld [vmem:[#allocation2 + $0x8] sm:$0xff] }
  0x38   :  { %391 = vmatprep.subr.bf16.mxu0 %v390_v40  ;;  %v404_v9 = vpack.c.bf16 %v92_v6, %v89_v3  ;;  %v434_v10 = vpack.c.bf16 %v94_v8, %v91_v7  ;;  %v45_v12 = vld [vmem:[#allocation2 + $0x10] sm:$0xff]  ;;  %v46_v13 = vld [vmem:[#allocation2 + $0x18] sm:$0xff]  ;;  %v95_v17 = vld [vmem:[%s597_s2] sm:$0x7]  ;;  %s525_s2 = smov [#allocation7]  }
  0x39   :  { %v100_v20 = vrot.slane %v95_v17, %v99_v16  ;;  %v104_v21 = vrot.slane %v95_v17, %v103_v18  ;;  %v108_v23 = vrot.slane %v95_v17, %v107_v19  ;;  %s303_s13 = sshll.u32 %s525_s2, 4  ;;  %s304_s13 = int_to_ptr.vmem [resolvable:$true] %s303_s13 }
  0x3a   :  { %421 = vmatpush3.bf16.msra.mxu1 %v418_v39  ;;  %s490_s14 = scalar_lea.vmem %s304_s13, 1536  ;;  %p495_p3 = scmp.lt.s32.totalorder %s304_s13, %s304_s13 }
  0x3b   :  { %393 = vmatpush1.bf16.msra.mxu0 %v392_v46  ;;  %423 = vmatprep.subr.bf16.mxu1 %v422_v48  ;;  %p491_p2 = scmp.ne.s32.totalorder %s304_s13, %s490_s14  ;;  %p496_p4 = scmp.lt.s32.totalorder %s490_s14, %s490_s14 }
  0x3c   :  { %395 = vmatprep.subr.bf16.mxu0 %v394_v50 }
  0x3d   :  { %p497_p5 = por %p496_p4, %p495_p3 }
  0x3e   :  { %425 = vmatpush3.bf16.msra.mxu1 %v422_v48 }
  0x3f   :  { %397 = vmatpush1.bf16.msra.mxu0 %v396_v56  ;;  %427 = vmatprep.subr.bf16.mxu1 %v426_v58  ;;  %p498_p6 = pnand %p497_p5, %p491_p2 }
  0x40   :  { %399 = vmatprep.subr.bf16.mxu0 %v398_v59 }
  0x42   :  { %429 = vmatpush3.bf16.msra.mxu1 %v426_v58 }
  0x43   :  { %401 = vmatpush1.bf16.msra.mxu0 %v400_v2  ;;  %431 = vmatprep.subr.bf16.mxu1 %v430_v4 }
  0x44   :  { %403 = vmatprep.subr.bf16.mxu0 %v402_v5 }
  0x46   :  { %433 = vmatpush3.bf16.msra.mxu1 %v430_v4 }
  0x47   :  { %405 = vmatpush1.bf16.msra.mxu0 %v404_v9  ;;  %435 = vmatprep.subr.bf16.mxu1 %v434_v10 }
  0x4a   :  { %177 = vmatmul.mubr.f32.vlgmr.msra.gmra.mrb[0].mxu0 %v43_v49  ;;  %437 = vmatpush3.bf16.msra.mxu1 %v434_v10 }
  0x4b   :  { %182 = vmatprep.mubr.f32.mxu0 %v524_v0 }
  0x4d   :  { %369 = vmatmul.mubr.f32.vlgmr.msra.gmra.mrb[0].mxu1 %v44_v11 }
  0x4e   :  { %183 = vmatmul.mubr.f32.gmra.mrb[2].mxu0 %v44_v11  ;;  %371 = vmatprep.mubr.f32.mxu1 %v45_v12 }
  0x4f   :  { %188 = vmatprep.mubr.f32.mxu0 %v524_v0 }
  0x51   :  { %372 = vmatmul.mubr.f32.gmra.mrb[2].mxu1 %v46_v13 }
  0x52   :  { %189 = vmatmul.mubr.f32.gmra.mrb[4].mxu0 %v45_v12 }
  0x53   :  { %194 = vmatprep.mubr.f32.mxu0 %v524_v0 }
  0x56   :  { %195 = vmatmul.mubr.f32.gmra.mrb[6].mxu0 %v46_v13 }
 0x11d   :  { %v178_v22 = vpop.f32.mrb[0].mxu0 }
 0x11e   :  { %v179_v24 = vadd.f32 %v178_v22, %v100_v20  ;;  %v180_v25 = vpop.f32.mrb[1].mxu0 }
 0x11f   :  { %v181_v26 = vadd.f32 %v180_v25, %v104_v21 }
 0x120   :  { %286 = vst [vmem:[#allocation7] sm:$0xff] %v179_v24  ;;  %v370_v27 = vpop.f32.mrb[0].mxu1 }
 0x121   :  { %287 = vst [vmem:[#allocation7 + $0x8] sm:$0xff] %v181_v26  ;;  %v184_v0 = vpop.f32.mrb[2].mxu0  ;;  %v273_v28 = vadd.f32 %v370_v27, %v108_v23  ;;  %v267_v29 = vpop.f32.mrb[1].mxu1 }
 0x122   :  { %v185_v30 = vadd.f32 %v184_v0, %v100_v20  ;;  %v186_v31 = vpop.f32.mrb[3].mxu0  ;;  %v268_v32 = vadd.f32 %v267_v29, %v108_v23 }
 0x123   :  { %v187_v33 = vadd.f32 %v186_v31, %v104_v21  ;;  %291 = vst [vmem:[#allocation7 + $0x28] sm:$0xff] %v273_v28 }
 0x124   :  { %289 = vst [vmem:[#allocation7 + $0x18] sm:$0xff] %v185_v30  ;;  %288 = vst [vmem:[#allocation7 + $0x10] sm:$0xff] %v268_v32  ;;  %v373_v34 = vpop.f32.mrb[2].mxu1 }
 0x125   :  { %290 = vst [vmem:[#allocation7 + $0x20] sm:$0xff] %v187_v33  ;;  %v190_v35 = vpop.f32.mrb[4].mxu0  ;;  %v283_v36 = vadd.f32 %v373_v34, %v108_v23  ;;  %v277_v37 = vpop.f32.mrb[3].mxu1 }
 0x126   :  { %v191_v38 = vadd.f32 %v190_v35, %v100_v20  ;;  %v192_v39 = vpop.f32.mrb[5].mxu0  ;;  %v278_v40 = vadd.f32 %v277_v37, %v108_v23 }
 0x127   :  { %v193_v41 = vadd.f32 %v192_v39, %v104_v21  ;;  %297 = vst [vmem:[#allocation7 + $0x58] sm:$0xff] %v283_v36 }
 0x128   :  { %292 = vst [vmem:[#allocation7 + $0x30] sm:$0xff] %v191_v38  ;;  %294 = vst [vmem:[#allocation7 + $0x40] sm:$0xff] %v278_v40 }
 0x129   :  { %293 = vst [vmem:[#allocation7 + $0x38] sm:$0xff] %v193_v41  ;;  %v196_v42 = vpop.f32.mrb[6].mxu0 }
 0x12a   :  { %v197_v43 = vadd.f32 %v196_v42, %v100_v20  ;;  %v198_v44 = vpop.f32.mrb[7].mxu0 }
 0x12b   :  { %v199_v45 = vadd.f32 %v198_v44, %v104_v21 }
 0x12c   :  { %295 = vst [vmem:[#allocation7 + $0x48] sm:$0xff] %v197_v43 }
 0x12d   :  { %296 = vst [vmem:[#allocation7 + $0x50] sm:$0xff] %v199_v45 }
 0x12e   :  { %501 = shalt.err (!%p498_p6)
}
 0x12f   :  { %s502_s17 = scalar_lea.hbm %s598_s3, 1536 }
 0x130   :  { %p503_p7 = scmp.ne.s32.totalorder %s598_s3, %s502_s17  ;;  %p506_p8 = scmp.lt.u32.totalorder %s502_s17, %s598_s3 }
 0x132   :  { %p508_p9 = pnand %p506_p8, %p503_p7 }
 0x134   :  { %511 = shalt.err (!%p508_p9)
}
 0x135   :  { %309 = dma.vmem_to_hbm [thread:$0]  %s304_s13, 1536, %s598_s3, [#allocation4], %s522_s0, %s522_s0, %s523_s9  }
 0x136   :  { %516 = dma.done.wait [#allocation4], 1536  }
 0x137   :  { %517 = vsyncadd [#allocation4], 4294965760 }
 0x138   :  { %313 = vsyncpa [#allocation3], 1 }
 0x139   :  { %314 = vsyncpa [#allocation6], 1 }
 0x13a   :  { %315 = vsyncpa [#allocation4], 1 }

</bundles_post_ra>
